<compile_context>
chip_gen: v7x
topology: tpu7x:2x2x1
jax: 0.10.0
libtpu: 0.0.40
codegen_flags: <defaults>
</compile_context>

<pallas_src>
import functools

import jax
import jax.numpy as jnp
import numpy as np
from jax import lax
from jax.experimental import pallas as pl
from jax.experimental.pallas import tpu as pltpu


# --------------------------- value network (MLP) -----------------------------
def value_mlp_kernel(x_ref, nx_ref, w1_ref, b1_ref, w2t_ref, b2_ref, v_ref, nv_ref):
    # Weights have a constant index_map -> resident in VMEM across the whole grid.
    w1 = w1_ref[...]            # (D, H)
    b1 = b1_ref[...]            # (1, H)
    w2t = w2t_ref[...]          # (1, H)  value head as a row vector
    b2 = b2_ref[...]            # (1, 1)

    def head(x):
        h = jnp.tanh(jnp.dot(x, w1, preferred_element_type=jnp.float32) + b1)  # (tm, H)
        # Lane-dense head: contract H of (1,H) with H of (tm,H) on the MXU
        # (same dimension_numbers as q@k^T in flash attention) -> (1, tm) row.
        v = lax.dot_general(w2t, h, dimension_numbers=(((1,), (1,)), ((), ())),
                            preferred_element_type=jnp.float32)
        return v + b2

    v_ref[...] = head(x_ref[...])       # obs values, (1, tm) lane-dense
    nv_ref[...] = head(nx_ref[...])     # next_obs values


def value_mlp(x, nx, w1, b1, w2t, b2):
    n, d = x.shape
    h_dim = w1.shape[1]
    itemsize = jnp.dtype(x.dtype).itemsize

    # Row tile derived from D: double-buffered activations (2 inputs x 2 buffers) plus
    # resident params must stay well under v5e's 16 MiB scoped-VMEM default; cap at
    # 8192 rows so small-D cases still amortize the ~0.35us per-grid-step overhead.
    budget = 8 * 1024 * 1024 - 2 * (d * h_dim + 2 * h_dim + 1) * 4
    per_row = 2 * 2 * d * itemsize
    tm_cap = max(128, min(8192, (max(budget, per_row * 128) // per_row) // 128 * 128))
    tm = n if n <= tm_cap else tm_cap           # tm==n: block dims equal full array dims
    grid = (pl.cdiv(n, tm),)

    cost = pl.CostEstimate(
        flops=2 * (2 * n * d * h_dim + 2 * n * h_dim),
        transcendentals=2 * n * h_dim,
        bytes_accessed=2 * n * d * itemsize + 2 * n * 4 + (d * h_dim + 2 * h_dim + 1) * 4,
    )

    return pl.pallas_call(
        value_mlp_kernel,
        out_shape=(jax.ShapeDtypeStruct((1, n), jnp.float32),
                   jax.ShapeDtypeStruct((1, n), jnp.float32)),
        grid=grid,
        in_specs=[
            pl.BlockSpec((tm, d), lambda i: (i, 0)),       # obs rows (pipelined)
            pl.BlockSpec((tm, d), lambda i: (i, 0)),       # next_obs rows (pipelined)
            pl.BlockSpec((d, h_dim), lambda i: (0, 0)),    # w1 (resident)
            pl.BlockSpec((1, h_dim), lambda i: (0, 0)),    # b1
            pl.BlockSpec((1, h_dim), lambda i: (0, 0)),    # w2^T
            pl.BlockSpec((1, 1), lambda i: (0, 0)),        # b2
        ],
        out_specs=(pl.BlockSpec((1, tm), lambda i: (0, i)),   # lane-dense value rows
                   pl.BlockSpec((1, tm), lambda i: (0, i))),
        compiler_params=pltpu.CompilerParams(dimension_semantics=("parallel",)),
        cost_estimate=cost,
    )(x, nx, w1, b1, w2t, b2)


# --------------------------------- GAE kernel --------------------------------
def gae_kernel(value_ref, next_value_ref, reward_ref, done_ref, *refs,
               gamma, lmbda, gradient_mode):
    if gradient_mode:
        adv_ref, vt_ref, verr_ref, c_ref = refs
    else:
        adv_ref, vt_ref, c_ref = refs
        verr_ref = None

    T = value_ref.shape[1]
    nd = 1.0 - done_ref[...].astype(jnp.float32)     # done arrives as int8

    # td0 / delta term lives in the adv output ref (scan working buffer); the hoisted
    # recursion coefficient lives in the c scratch.
    adv_ref[...] = reward_ref[...] + gamma * nd * next_value_ref[...] - value_ref[...]
    c_ref[...] = (gamma * lmbda) * nd

    # Reverse inclusive scan over time (the lane axis): adv_t = d_t + c_t * adv_{t+1}.
    # (c, d) pairs compose associatively: (c1,d1)o(c2,d2) = (c1*c2, d1 + c1*d2), so the
    # T-1-step serial carry chain becomes ceil(log2 T) full-vreg passes.  Done in place
    # with static ref slices; positions t >= T-off are already final at each step, which
    # plays the role of combining with the identity element.
    off = 1
    while off < T:
        w = T - off
        d_lo = adv_ref[:, pl.ds(0, w)]
        c_lo = c_ref[:, pl.ds(0, w)]
        d_hi = adv_ref[:, pl.ds(off, w)]
        c_hi = c_ref[:, pl.ds(off, w)]
        adv_ref[:, pl.ds(0, w)] = d_lo + c_lo * d_hi
        c_ref[:, pl.ds(0, w)] = c_lo * c_hi
        off *= 2

    adv = adv_ref[...]
    vt_ref[...] = adv + value_ref[...]     # value_target
    if gradient_mode:
        verr_ref[...] = adv                # value_target - state_value == advantage


# --------------------------------- wrapper ------------------------------------
def gae_forward(obs, next_obs, reward, done, params, *, gamma=0.99, lmbda=0.95,
                average_rewards=False, gradient_mode=True, use_bf16=False):
    B, T, D = obs.shape
    w1, b1, w2, b2 = params

    act_dt = jnp.bfloat16 if use_bf16 else jnp.float32   # bf16 path halves HBM bytes
    x = obs.reshape(B * T, D).astype(act_dt)
    nx = next_obs.reshape(B * T, D).astype(act_dt)
    w1f = w1.astype(act_dt)
    b1f = b1.reshape(1, -1).astype(jnp.float32)
    w2t = w2.reshape(1, -1).astype(jnp.float32)          # (H,1) -> (1,H) value-head row
    b2f = b2.reshape(1, 1).astype(jnp.float32)

    # value_network applied to obs and step_mdp's next_obs in one pipelined call;
    # (1, B*T) lane-dense rows reshape (no transpose) straight into (B, T).
    value_row, next_value_row = value_mlp(x, nx, w1f, b1f, w2t, b2f)
    value = value_row.reshape(B, T)
    next_value = next_value_row.reshape(B, T)

    r = reward[..., 0].astype(jnp.float32)               # (B, T), native layout
    if average_rewards:
        # global mean/std (torch.std -> unbiased, clamp_min 1e-4); kept in the wrapper
        # so the statistics stay global when the GAE grid tiles the batch axis.
        r = r - jnp.mean(r)
        r = r / jnp.maximum(jnp.std(r, ddof=1), 1e-4)
    done_i8 = done[..., 0].astype(jnp.int8)               # narrow dtype, cast in-kernel

    # batch tile: multiple of 32 rows (int8 sublane tiling) sized so all live blocks fit
    # the smallest scoped-VMEM defaults; "parallel" so v7x can shard across TensorCores.
    per_elem = 2 * (3 * 4 + 1 + (3 + int(gradient_mode)) * 4) + 4
    tb_cap = max(32, min(1024, (8 * 1024 * 1024 // (per_elem * T)) // 32 * 32))
    tb = B if B <= tb_cap else tb_cap
    grid = (pl.cdiv(B, tb),)
    # TODO(synk): extremely long trajectories (tb=32 block still overflowing VMEM) would
    # additionally need the time axis tiled with a cross-tile carry fix-up.

    n_out = 3 if gradient_mode else 2
    blk = pl.BlockSpec((tb, T), lambda i: (i, 0))
    outs = pl.pallas_call(
        functools.partial(gae_kernel, gamma=float(gamma), lmbda=float(lmbda),
                          gradient_mode=gradient_mode),
        out_shape=tuple(jax.ShapeDtypeStruct((B, T), jnp.float32) for _ in range(n_out)),
        grid=grid,
        in_specs=[blk, blk, blk, blk],
        out_specs=tuple(blk for _ in range(n_out)),
        scratch_shapes=[pltpu.VMEM((tb, T), jnp.float32)],     # recursion coefficient
        compiler_params=pltpu.CompilerParams(dimension_semantics=("parallel",)),
    )(value, next_value, r, done_i8)

    if gradient_mode:
        adv, vt, verr = outs
    else:
        adv, vt = outs
        verr = None

    out = {
        "state_value": value[..., None],
        "advantage": lax.stop_gradient(adv[..., None]),    # detached in torchrl
        "value_target": vt[..., None],
        "reward": r[..., None],
    }
    if gradient_mode:
        out["value_error"] = verr[..., None]
    return out
    # TODO(synk): tensordict plumbing (set/get keys, step_mdp renaming, hold_out_net,
    # functional param swapping, autograd gradient_mode) has no Pallas equivalent; only
    # the numerical forward pass is reproduced.


# ------------------------------ pure-JAX reference ----------------------------
def _ref_forward(obs, next_obs, reward, done, params, gamma, lmbda):
    w1, b1, w2, b2 = params

    def v(o):
        h = jnp.tanh(o.reshape(-1, o.shape[-1]) @ w1 + b1)
        return (h @ w2 + b2).reshape(o.shape[:-1])

    value, next_value = v(obs), v(next_obs)                  # [B, T]
    nd = 1.0 - done[..., 0].astype(jnp.float32)
    r = reward[..., 0].astype(jnp.float32)
    delta = r + gamma * nd * next_value - value

    def scan_fn(carry, x_):
        d_, n_ = x_
        adv = d_ + gamma * lmbda * n_ * carry
        return adv, adv

    _, adv_t = lax.scan(scan_fn, jnp.zeros(obs.shape[0], jnp.float32),
                        (delta.T, nd.T), reverse=True)
    adv = adv_t.T
    return adv, adv + value, value


if __name__ == "__main__":
    B, T, D, H = 8, 16, 32, 32
    gamma, lmbda = 0.99, 0.95

    key = jax.random.PRNGKey(0)
    k_obs, k_nobs, k_rew, k_done, k_w1, k_b1, k_w2, k_b2 = jax.random.split(key, 8)

    obs = jax.random.normal(k_obs, (B, T, D), dtype=jnp.float32)
    next_obs = jax.random.normal(k_nobs, (B, T, D), dtype=jnp.float32)
    reward = jax.random.normal(k_rew, (B, T, 1), dtype=jnp.float32)
    done = jax.random.bernoulli(k_done, 0.1, (B, T, 1))

    # value network: Linear(D,H) -> tanh -> Linear(H,1)
    w1 = jax.random.normal(k_w1, (D, H), dtype=jnp.float32) / np.sqrt(D)
    b1 = jax.random.normal(k_b1, (1, H), dtype=jnp.float32) * 0.01
    w2 = jax.random.normal(k_w2, (H, 1), dtype=jnp.float32) / np.sqrt(H)
    b2 = jax.random.normal(k_b2, (1, 1), dtype=jnp.float32) * 0.01
    params = (w1, b1, w2, b2)

    tol = dict(rtol=2e-5, atol=2e-5)

    # --- gradient_mode=True, average_rewards=False -----------------------------
    out = gae_forward(obs, next_obs, reward, done, params,
                      gamma=gamma, lmbda=lmbda,
                      average_rewards=False, gradient_mode=True)
    jax.block_until_ready(out)

    adv_r, vt_r, val_r = _ref_forward(obs, next_obs, reward, done, params, gamma, lmbda)
    np.testing.assert_allclose(np.asarray(out["state_value"][..., 0]),
                               np.asarray(val_r), **tol)
    np.testing.assert_allclose(np.asarray(out["advantage"][..., 0]),
                               np.asarray(adv_r), **tol)
    np.testing.assert_allclose(np.asarray(out["value_target"][..., 0]),
                               np.asarray(vt_r), **tol)
    np.testing.assert_allclose(np.asarray(out["value_error"]),
                               np.asarray(out["value_target"] - out["state_value"]), **tol)

    # --- gradient_mode=False, average_rewards=True ------------------------------
    out2 = gae_forward(obs, next_obs, reward, done, params,
                       gamma=gamma, lmbda=lmbda,
                       average_rewards=True, gradient_mode=False)
    jax.block_until_ready(out2)

    r_ = reward[..., 0]
    r_std = (r_ - r_.mean()) / jnp.maximum(r_.std(ddof=1), 1e-4)
    adv_r2, _, _ = _ref_forward(obs, next_obs, r_std[..., None], done, params,
                                gamma, lmbda)
    np.testing.assert_allclose(np.asarray(out2["reward"][..., 0]),
                               np.asarray(r_std), **tol)
    np.testing.assert_allclose(np.asarray(out2["advantage"][..., 0]),
                               np.asarray(adv_r2), **tol)
    assert "value_error" not in out2

    print("KERNEL_OK")
</pallas_src>

<mosaic_0001>
module attributes {stable_mosaic.version = 11 : i64} {
  func.func @value_mlp_kernel(%arg0: i32, %arg1: memref<128x32xf32, #tpu.memory_space<vmem>>, %arg2: memref<128x32xf32, #tpu.memory_space<vmem>>, %arg3: memref<32x32xf32, #tpu.memory_space<vmem>>, %arg4: memref<1x32xf32, #tpu.memory_space<vmem>>, %arg5: memref<1x32xf32, #tpu.memory_space<vmem>>, %arg6: memref<1x1xf32, #tpu.memory_space<vmem>>, %arg7: memref<1x128xf32, #tpu.memory_space<vmem>>, %arg8: memref<1x128xf32, #tpu.memory_space<vmem>>) attributes {dimension_semantics = [#tpu.dimension_semantics<parallel>], iteration_bounds = array<i64: 1>, scalar_prefetch = 0 : i64, scratch_operands = 0 : i64, tpu.core_type = #tpu.core_type<tc>, window_params = [{transform_indices = @transform_0, window_bounds = array<i64: 128, 32>}, {transform_indices = @transform_1, window_bounds = array<i64: 128, 32>}, {pipeline_mode = #tpu.pipeline_mode<synchronous>, transform_indices = @transform_2, window_bounds = array<i64: 32, 32>}, {pipeline_mode = #tpu.pipeline_mode<synchronous>, transform_indices = @transform_3, window_bounds = array<i64: 1, 32>}, {pipeline_mode = #tpu.pipeline_mode<synchronous>, transform_indices = @transform_4, window_bounds = array<i64: 1, 32>}, {pipeline_mode = #tpu.pipeline_mode<synchronous>, transform_indices = @transform_5, window_bounds = array<i64: 1, 1>}, {transform_indices = @transform_6, window_bounds = array<i64: 1, 128>}, {transform_indices = @transform_7, window_bounds = array<i64: 1, 128>}]} {
    %c0 = arith.constant 0 : index
    %c0_0 = arith.constant 0 : index
    %0 = vector.load %arg3[%c0, %c0_0] : memref<32x32xf32, #tpu.memory_space<vmem>>, vector<32x32xf32>
    %c0_1 = arith.constant 0 : index
    %c0_2 = arith.constant 0 : index
    %1 = vector.load %arg4[%c0_1, %c0_2] : memref<1x32xf32, #tpu.memory_space<vmem>>, vector<1x32xf32>
    %c0_3 = arith.constant 0 : index
    %c0_4 = arith.constant 0 : index
    %2 = vector.load %arg5[%c0_3, %c0_4] : memref<1x32xf32, #tpu.memory_space<vmem>>, vector<1x32xf32>
    %c0_5 = arith.constant 0 : index
    %c0_6 = arith.constant 0 : index
    %3 = vector.load %arg6[%c0_5, %c0_6] : memref<1x1xf32, #tpu.memory_space<vmem>>, vector<1x1xf32>
    %c0_7 = arith.constant 0 : index
    %c0_8 = arith.constant 0 : index
    %4 = vector.load %arg1[%c0_7, %c0_8] : memref<128x32xf32, #tpu.memory_space<vmem>>, vector<128x32xf32>
    %cst = arith.constant dense<0.000000e+00> : vector<128x32xf32>
    %5 = tpu.matmul %4, %0, %cst {dimension_numbers = #tpu.dot_dimension_numbers<[1], [0], [0], [1], [0, 0, 1, 1], [], []>} : vector<128x32xf32>, vector<32x32xf32>, vector<128x32xf32> -> vector<128x32xf32>
    %6 = vector.broadcast %1 : vector<1x32xf32> to vector<128x32xf32>
    %7 = arith.addf %5, %6 : vector<128x32xf32>
    %8 = math.tanh %7 : vector<128x32xf32>
    %cst_9 = arith.constant dense<0.000000e+00> : vector<1x128xf32>
    %9 = tpu.matmul %2, %8, %cst_9 {dimension_numbers = #tpu.dot_dimension_numbers<[1], [1], [0], [0], [0, 0, 1, 0], [], []>} : vector<1x32xf32>, vector<128x32xf32>, vector<1x128xf32> -> vector<1x128xf32>
    %10 = vector.broadcast %3 : vector<1x1xf32> to vector<1x128xf32>
    %11 = arith.addf %9, %10 : vector<1x128xf32>
    %c0_10 = arith.constant 0 : index
    %c0_11 = arith.constant 0 : index
    %12 = vector.load %arg7[%c0_10, %c0_11] : memref<1x128xf32, #tpu.memory_space<vmem>>, vector<1x128xf32>
    tpu.vector_store %arg7[%c0_10, %c0_11], %11 {strides = array<i32>} : memref<1x128xf32, #tpu.memory_space<vmem>>, vector<1x128xf32>,
    %c0_12 = arith.constant 0 : index
    %c0_13 = arith.constant 0 : index
    %13 = vector.load %arg2[%c0_12, %c0_13] : memref<128x32xf32, #tpu.memory_space<vmem>>, vector<128x32xf32>
    %cst_14 = arith.constant dense<0.000000e+00> : vector<128x32xf32>
    %14 = tpu.matmul %13, %0, %cst_14 {dimension_numbers = #tpu.dot_dimension_numbers<[1], [0], [0], [1], [0, 0, 1, 1], [], []>} : vector<128x32xf32>, vector<32x32xf32>, vector<128x32xf32> -> vector<128x32xf32>
    %15 = vector.broadcast %1 : vector<1x32xf32> to vector<128x32xf32>
    %16 = arith.addf %14, %15 : vector<128x32xf32>
    %17 = math.tanh %16 : vector<128x32xf32>
    %cst_15 = arith.constant dense<0.000000e+00> : vector<1x128xf32>
    %18 = tpu.matmul %2, %17, %cst_15 {dimension_numbers = #tpu.dot_dimension_numbers<[1], [1], [0], [0], [0, 0, 1, 0], [], []>} : vector<1x32xf32>, vector<128x32xf32>, vector<1x128xf32> -> vector<1x128xf32>
    %19 = vector.broadcast %3 : vector<1x1xf32> to vector<1x128xf32>
    %20 = arith.addf %18, %19 : vector<1x128xf32>
    %c0_16 = arith.constant 0 : index
    %c0_17 = arith.constant 0 : index
    %21 = vector.load %arg8[%c0_16, %c0_17] : memref<1x128xf32, #tpu.memory_space<vmem>>, vector<1x128xf32>
    tpu.vector_store %arg8[%c0_16, %c0_17], %20 {strides = array<i32>} : memref<1x128xf32, #tpu.memory_space<vmem>>, vector<1x128xf32>,
    return
  }
  func.func @transform_0(%arg0: i32) -> (i32, i32) {
    %c0_i32 = arith.constant 0 : i32
    %c0_i32_0 = arith.constant 0 : i32
    return %arg0, %c0_i32 : i32, i32
  }
  func.func @transform_1(%arg0: i32) -> (i32, i32) {
    %c0_i32 = arith.constant 0 : i32
    %c0_i32_0 = arith.constant 0 : i32
    return %arg0, %c0_i32 : i32, i32
  }
  func.func @transform_2(%arg0: i32) -> (i32, i32) {
    %c0_i32 = arith.constant 0 : i32
    %c0_i32_0 = arith.constant 0 : i32
    %c0_i32_1 = arith.constant 0 : i32
    return %c0_i32, %c0_i32_0 : i32, i32
  }
  func.func @transform_3(%arg0: i32) -> (i32, i32) {
    %c0_i32 = arith.constant 0 : i32
    %c0_i32_0 = arith.constant 0 : i32
    %c0_i32_1 = arith.constant 0 : i32
    return %c0_i32, %c0_i32_0 : i32, i32
  }
  func.func @transform_4(%arg0: i32) -> (i32, i32) {
    %c0_i32 = arith.constant 0 : i32
    %c0_i32_0 = arith.constant 0 : i32
    %c0_i32_1 = arith.constant 0 : i32
    return %c0_i32, %c0_i32_0 : i32, i32
  }
  func.func @transform_5(%arg0: i32) -> (i32, i32) {
    %c0_i32 = arith.constant 0 : i32
    %c0_i32_0 = arith.constant 0 : i32
    %c0_i32_1 = arith.constant 0 : i32
    return %c0_i32, %c0_i32_0 : i32, i32
  }
  func.func @transform_6(%arg0: i32) -> (i32, i32) {
    %c0_i32 = arith.constant 0 : i32
    %c0_i32_0 = arith.constant 0 : i32
    return %c0_i32, %arg0 : i32, i32
  }
  func.func @transform_7(%arg0: i32) -> (i32, i32) {
    %c0_i32 = arith.constant 0 : i32
    %c0_i32_0 = arith.constant 0 : i32
    return %c0_i32, %arg0 : i32, i32
  }
}

</mosaic_0001>

<bundles_post_ra>
// kernel: tpu_custom_call.1
= control target key start
LH: loop header
LB: loop body
LE: loop exit
PB: predicated region body
PF: predicated region fallthrough
CT: control target
= control target key end

     0   :  { %s1562_s0 = inlined_call_operand.vmem [shape: f32[128,32], index: 0, kind: input, shape index: {}]   ;;  %s1563_s1 = inlined_call_operand.vmem [shape: f32[128,32], index: 1, kind: input, shape index: {}]   ;;  %s1564_s2 = inlined_call_operand.vmem [shape: f32[32,32], index: 2, kind: input, shape index: {}]   ;;  %s1565_s3 = inlined_call_operand.vmem [shape: f32[1,32], index: 3, kind: input, shape index: {}]   ;;  %s1566_s4 = inlined_call_operand.vmem [shape: f32[1,32], index: 4, kind: input, shape index: {}]   ;;  %s1567_s5 = inlined_call_operand.<no memory space> [shape: f32[1,1], index: 5, kind: input, shape index: {}]   ;;  %s1568_s6 = inlined_call_operand.hbm [shape: f32[1,128], index: 6, kind: output, shape index: {0}]   ;;  %s1569_s7 = inlined_call_operand.hbm [shape: f32[1,128], index: 7, kind: output, shape index: {1}]  }
   0x1   :  { %v13_v0 = vstv %s1567_s5 }
   0x2   :  { %14 = vst [vmem:[#allocation2] sm:$0x1] %v13_v0 }
   0x3   :  { %15 = vsyncpa [#allocation4], 0  ;;  %v29_v1 = vld [vmem:[%s1564_s2] sm:$0xff]  ;;  %v30_v2 = vld [vmem:[%s1564_s2 + $0x8] sm:$0xff]  ;;  %vm58_vm0 = vcmask 261120  }
   0x4   :  { %v31_v3 = vld [vmem:[%s1564_s2 + $0x10] sm:$0xff]  ;;  %v1046_v4 = vpack.c.bf16 %v30_v2, %v29_v1  ;;  %v32_v5 = vld [vmem:[%s1564_s2 + $0x18] sm:$0xff]  ;;  %v36_v6 = vld [vmem:[%s1562_s0] sm:$0xff] }
   0x5   :  { %v399_v7 = vld [vmem:[%s1563_s1] sm:$0xff]  ;;  %v1050_v8 = vpack.c.bf16 %v32_v5, %v31_v3  ;;  %920 = vmatprep.mubr.msk.f32.mxu1 %vm58_vm0, %v36_v6  ;;  %v37_v9 = vld [vmem:[%s1562_s0 + $0x8] sm:$0xff]  ;;  %v38_v11 = vld [vmem:[%s1562_s0 + $0x10] sm:$0xff] }
   0x6   :  { %987 = vmatprep.mubr.msk.f32.mxu0 %vm58_vm0, %v399_v7  ;;  %1047 = vmatprep.subr.bf16.mxu1 %v1046_v4  ;;  %v400_v10 = vld [vmem:[%s1563_s1 + $0x8] sm:$0xff]  ;;  %v401_v12 = vld [vmem:[%s1563_s1 + $0x10] sm:$0xff]  ;;  %v39_v13 = vld [vmem:[%s1562_s0 + $0x18] sm:$0xff] }
   0x7   :  { %1087 = vmatprep.subr.bf16.mxu0 %v1046_v4  ;;  %1049 = vmatpush3.bf16.msra.mxu1 %v1046_v4  ;;  %v402_v14 = vld [vmem:[%s1563_s1 + $0x18] sm:$0xff] }
   0x8   :  { %1089 = vmatpush3.bf16.msra.mxu0 %v1046_v4  ;;  %1051 = vmatprep.subr.bf16.mxu1 %v1050_v8 }
   0x9   :  { %1091 = vmatprep.subr.bf16.mxu0 %v1050_v8 }
   0xb   :  { %1053 = vmatpush3.bf16.msra.mxu1 %v1050_v8 }
   0xc   :  { %1093 = vmatpush3.bf16.msra.mxu0 %v1050_v8 }
   0xe   :  { %921 = vmatmul.mubr.msk.f32.vlgmr.msra.gmra.mrb[0].mxu1 %vm58_vm0, %v37_v9 }
   0xf   :  { %988 = vmatmul.mubr.msk.f32.vlgmr.msra.gmra.mrb[0].mxu0 %vm58_vm0, %v400_v10  ;;  %923 = vmatprep.mubr.msk.f32.mxu1 %vm58_vm0, %v38_v11 }
  0x10   :  { %990 = vmatprep.mubr.msk.f32.mxu0 %vm58_vm0, %v401_v12 }
  0x11   :  { %16 = vsyncpa [#allocation6], 0  ;;  %v40_v15 = vld [vmem:[%s1562_s0 + $0x20] sm:$0xff]  ;;  %v41_v17 = vld [vmem:[%s1562_s0 + $0x28] sm:$0xff]  ;;  %v1245_v39 = vmov 0.0|0.0   ;;  %vm1246_vm1 = vmmov 0  }
  0x12   :  { %v403_v16 = vld [vmem:[%s1563_s1 + $0x20] sm:$0xff]  ;;  %924 = vmatmul.mubr.msk.f32.gmra.mrb[2].mxu1 %vm58_vm0, %v39_v13  ;;  %v404_v18 = vld [vmem:[%s1563_s1 + $0x28] sm:$0xff]  ;;  %v42_v19 = vld [vmem:[%s1562_s0 + $0x30] sm:$0xff]  ;;  %1054 = vmatprep.subr.bf16.mxu1 %v1245_v39  ;;  %v1247_v40 = vmov 0.0   ;;  %v1248_v42 = vmov 0   ;;  %s1249_s24 = smov [#allocation3]  }
  0x13   :  { %991 = vmatmul.mubr.msk.f32.gmra.mrb[2].mxu0 %vm58_vm0, %v402_v14  ;;  %926 = vmatprep.mubr.msk.f32.mxu1 %vm58_vm0, %v40_v15  ;;  %v405_v20 = vld [vmem:[%s1563_s1 + $0x30] sm:$0xff]  ;;  %v43_v21 = vld [vmem:[%s1562_s0 + $0x38] sm:$0xff]  ;;  %v44_v23 = vld [vmem:[%s1562_s0 + $0x40] sm:$0xff]  ;;  %s749_s25 = sshll.u32 %s1249_s24, 4  ;;  %s1250_s26 = smov [#allocation5]   ;;  %s750_s25 = int_to_ptr.vmem [resolvable:$true] %s749_s25 }
  0x14   :  { %993 = vmatprep.mubr.msk.f32.mxu0 %vm58_vm0, %v403_v16  ;;  %v406_v22 = vld [vmem:[%s1563_s1 + $0x38] sm:$0xff]  ;;  %v407_v24 = vld [vmem:[%s1563_s1 + $0x40] sm:$0xff]  ;;  %v45_v25 = vld [vmem:[%s1562_s0 + $0x48] sm:$0xff]  ;;  %1094 = vmatprep.subr.bf16.mxu0 %v1245_v39  ;;  %s759_s27 = sshll.u32 %s1250_s26, 4  ;;  %s1201_s28 = scalar_lea.vmem %s750_s25, 32  ;;  %s1530_s27 = int_to_ptr.vmem [resolvable:$true] %s759_s27 }
  0x15   :  { %v408_v26 = vld [vmem:[%s1563_s1 + $0x48] sm:$0xff]  ;;  %v46_v27 = vld [vmem:[%s1562_s0 + $0x50] sm:$0xff]  ;;  %v47_v29 = vld [vmem:[%s1562_s0 + $0x58] sm:$0xff]  ;;  %1132 = vset.pattern.permute.xlu0 %v1248_v42  ;;  %p1202_p1 = scmp.lt.s32.totalorder %s750_s25, %s750_s25 }
  0x16   :  { %927 = vmatmul.mubr.msk.f32.gmra.mrb[4].mxu1 %vm58_vm0, %v41_v17  ;;  %v409_v28 = vld [vmem:[%s1563_s1 + $0x50] sm:$0xff]  ;;  %v410_v30 = vld [vmem:[%s1563_s1 + $0x58] sm:$0xff]  ;;  %v48_v31 = vld [vmem:[%s1562_s0 + $0x60] sm:$0xff] }
  0x17   :  { %994 = vmatmul.mubr.msk.f32.gmra.mrb[4].mxu0 %vm58_vm0, %v404_v18  ;;  %929 = vmatprep.mubr.msk.f32.mxu1 %vm58_vm0, %v42_v19  ;;  %v411_v32 = vld [vmem:[%s1563_s1 + $0x60] sm:$0xff]  ;;  %v49_v33 = vld [vmem:[%s1562_s0 + $0x68] sm:$0xff]  ;;  %v50_v35 = vld [vmem:[%s1562_s0 + $0x70] sm:$0xff] }
  0x18   :  { %996 = vmatprep.mubr.msk.f32.mxu0 %vm58_vm0, %v405_v20  ;;  %v412_v34 = vld [vmem:[%s1563_s1 + $0x68] sm:$0xff]  ;;  %v413_v36 = vld [vmem:[%s1563_s1 + $0x70] sm:$0xff]  ;;  %v51_v37 = vld [vmem:[%s1562_s0 + $0x78] sm:$0xff] }
  0x19   :  { %v414_v38 = vld [vmem:[%s1563_s1 + $0x78] sm:$0xff]  ;;  %v35_v41 = vld [vmem:[#allocation2] sm:$0x1]  ;;  %vm1459_vm2 = vmpackc.low %vm58_vm0, %vm58_vm0 }
  0x1a   :  { %930 = vmatmul.mubr.msk.f32.gmra.mrb[6].mxu1 %vm58_vm0, %v43_v21  ;;  %270 = vperm.xlu0 %1132, %v35_v41   ;;  %v1439_v43 = vld [vmem:[%s1565_s3] ss:$0 sm:$0xff] }
  0x1b   :  { %997 = vmatmul.mubr.msk.f32.gmra.mrb[6].mxu0 %vm58_vm0, %v406_v22  ;;  %932 = vmatprep.mubr.msk.f32.mxu1 %vm58_vm0, %v44_v23 }
  0x1c   :  { %999 = vmatprep.mubr.msk.f32.mxu0 %vm58_vm0, %v407_v24 }
  0x1e   :  { %933 = vmatmul.mubr.msk.f32.gmra.mrb[8].mxu1 %vm58_vm0, %v45_v25 }
  0x1f   :  { %1000 = vmatmul.mubr.msk.f32.gmra.mrb[8].mxu0 %vm58_vm0, %v408_v26  ;;  %935 = vmatprep.mubr.msk.f32.mxu1 %vm58_vm0, %v46_v27 }
  0x20   :  { %1002 = vmatprep.mubr.msk.f32.mxu0 %vm58_vm0, %v409_v28 }
  0x22   :  { %936 = vmatmul.mubr.msk.f32.gmra.mrb[10].mxu1 %vm58_vm0, %v47_v29 }
  0x23   :  { %1003 = vmatmul.mubr.msk.f32.gmra.mrb[10].mxu0 %vm58_vm0, %v410_v30  ;;  %938 = vmatprep.mubr.msk.f32.mxu1 %vm58_vm0, %v48_v31 }
  0x24   :  { %1005 = vmatprep.mubr.msk.f32.mxu0 %vm58_vm0, %v411_v32 }
  0x26   :  { %939 = vmatmul.mubr.msk.f32.gmra.mrb[12].mxu1 %vm58_vm0, %v49_v33 }
  0x27   :  { %1006 = vmatmul.mubr.msk.f32.gmra.mrb[12].mxu0 %vm58_vm0, %v412_v34  ;;  %941 = vmatprep.mubr.msk.f32.mxu1 %vm58_vm0, %v50_v35 }
  0x28   :  { %1008 = vmatprep.mubr.msk.f32.mxu0 %vm58_vm0, %v413_v36 }
  0x2a   :  { %942 = vmatmul.mubr.msk.f32.gmra.mrb[14].mxu1 %vm58_vm0, %v51_v37 }
  0x2b   :  { %1009 = vmatmul.mubr.msk.f32.gmra.mrb[14].mxu0 %vm58_vm0, %v414_v38  ;;  %976 = vmatprep.mubr.msk.f32.mxu1 %vm1246_vm1, %v1247_v40 }
  0x2c   :  { %1043 = vmatprep.mubr.msk.f32.mxu0 %vm1246_vm1, %v1247_v40 }
  0xe1   :  { %v922_v44 = vpop.f32.mrb[0].mxu1 }
  0xe2   :  { %v989_v45 = vpop.f32.mrb[0].mxu0  ;;  %v179_v46 = vadd.f32 %v922_v44, %v1439_v43  ;;  %v173_v48 = vpop.f32.mrb[1].mxu1 }
  0xe3   :  { %v535_v47 = vadd.f32 %v989_v45, %v1439_v43  ;;  %v529_v49 = vpop.f32.mrb[1].mxu0  ;;  %v174_v50 = vadd.f32 %v1439_v43, %v173_v48 }
  0xe4   :  { %v530_v51 = vadd.f32 %v1439_v43, %v529_v49  ;;  %1133 = vtanh.f32 %v179_v46 }
  0xe5   :  { %1135 = vtanh.f32 %v535_v47  ;;  %v925_v52 = vpop.f32.mrb[2].mxu1 }
  0xe6   :  { %v992_v53 = vpop.f32.mrb[2].mxu0  ;;  %1137 = vtanh.f32 %v174_v50  ;;  %v189_v54 = vadd.f32 %v925_v52, %v1439_v43  ;;  %v183_v56 = vpop.f32.mrb[3].mxu1 }
  0xe7   :  { %v545_v55 = vadd.f32 %v992_v53, %v1439_v43  ;;  %v539_v57 = vpop.f32.mrb[3].mxu0  ;;  %1139 = vtanh.f32 %v530_v51  ;;  %v184_v58 = vadd.f32 %v1439_v43, %v183_v56 }
  0xe8   :  { %v540_v59 = vadd.f32 %v1439_v43, %v539_v57  ;;  %1141 = vtanh.f32 %v189_v54 }
  0xe9   :  { %1143 = vtanh.f32 %v545_v55  ;;  %v928_v60 = vpop.f32.mrb[4].mxu1 }
  0xea   :  { %v995_v61 = vpop.f32.mrb[4].mxu0  ;;  %1145 = vtanh.f32 %v184_v58  ;;  %v199_v62 = vadd.f32 %v928_v60, %v1439_v43  ;;  %v193_v0 = vpop.f32.mrb[5].mxu1 }
  0xeb   :  { %v555_v63 = vadd.f32 %v995_v61, %v1439_v43  ;;  %v549_v1 = vpop.f32.mrb[5].mxu0  ;;  %1147 = vtanh.f32 %v540_v59  ;;  %v194_v2 = vadd.f32 %v1439_v43, %v193_v0 }
  0xec   :  { %v550_v3 = vadd.f32 %v1439_v43, %v549_v1  ;;  %1149 = vtanh.f32 %v199_v62 }
  0xed   :  { %1151 = vtanh.f32 %v555_v63  ;;  %v931_v4 = vpop.f32.mrb[6].mxu1 }
  0xee   :  { %v998_v5 = vpop.f32.mrb[6].mxu0  ;;  %v1134_v6 = vpop.eup %1133  ;;  %1153 = vtanh.f32 %v194_v2  ;;  %v209_v7 = vadd.f32 %v931_v4, %v1439_v43 }
  0xef   :  { %v565_v8 = vadd.f32 %v998_v5, %v1439_v43  ;;  %v203_v9 = vpop.f32.mrb[7].mxu1  ;;  %v559_v10 = vpop.f32.mrb[7].mxu0  ;;  %1155 = vtanh.f32 %v550_v3 }
  0xf0   :  { %v1136_v11 = vpop.eup %1135  ;;  %v204_v12 = vadd.f32 %v1439_v43, %v203_v9  ;;  %v560_v13 = vadd.f32 %v1439_v43, %v559_v10  ;;  %1157 = vtanh.f32 %v209_v7 }
  0xf1   :  { %v1138_v14 = vpop.eup %1137  ;;  %1159 = vtanh.f32 %v565_v8  ;;  %v934_v18 = vpop.f32.mrb[8].mxu1 }
  0xf2   :  { %v1140_v16 = vpop.eup %1139  ;;  %v1055_v17 = vpack.c.bf16 %v1134_v6, %v1138_v14  ;;  %v1001_v19 = vpop.f32.mrb[8].mxu0  ;;  %1161 = vtanh.f32 %v204_v12  ;;  %v219_v22 = vadd.f32 %v934_v18, %v1439_v43 }
  0xf3   :  { %v1142_v20 = vpop.eup %1141  ;;  %v1095_v21 = vpack.c.bf16 %v1136_v11, %v1140_v16  ;;  %v575_v23 = vadd.f32 %v1001_v19, %v1439_v43  ;;  %v213_v24 = vpop.f32.mrb[9].mxu1  ;;  %1163 = vtanh.f32 %v560_v13 }
  0xf4   :  { %v569_v25 = vpop.f32.mrb[9].mxu0  ;;  %v1144_v26 = vpop.eup %1143  ;;  %1057 = vmatpush3.bf16.xpose.msk.msra.mxu1 %vm1459_vm2, %v1055_v17  ;;  %v214_v27 = vadd.f32 %v1439_v43, %v213_v24  ;;  %1165 = vtanh.f32 %v219_v22 }
  0xf5   :  { %v570_v28 = vadd.f32 %v1439_v43, %v569_v25  ;;  %v1146_v29 = vpop.eup %1145  ;;  %1097 = vmatpush3.bf16.xpose.msk.msra.mxu0 %vm1459_vm2, %v1095_v21  ;;  %1058 = vmatprep.subr.bf16.mxu1 %v1245_v39  ;;  %1167 = vtanh.f32 %v575_v23  ;;  %v937_v32 = vpop.f32.mrb[10].mxu1 }
  0xf6   :  { %v1148_v30 = vpop.eup %1147  ;;  %1098 = vmatprep.subr.bf16.mxu0 %v1245_v39  ;;  %v1059_v31 = vpack.c.bf16 %v1142_v20, %v1146_v29  ;;  %v1004_v33 = vpop.f32.mrb[10].mxu0  ;;  %1169 = vtanh.f32 %v214_v27  ;;  %v229_v36 = vadd.f32 %v937_v32, %v1439_v43  ;;  %v273_v32 = vlaneseq }
  0xf7   :  { %v1150_v34 = vpop.eup %1149  ;;  %v1099_v35 = vpack.c.bf16 %v1144_v26, %v1148_v30  ;;  %v585_v37 = vadd.f32 %v1004_v33, %v1439_v43  ;;  %v223_v38 = vpop.f32.mrb[11].mxu1  ;;  %1171 = vtanh.f32 %v570_v28 }
  0xf8   :  { %v579_v40 = vpop.f32.mrb[11].mxu0  ;;  %v1152_v41 = vpop.eup %1151  ;;  %v224_v42 = vadd.f32 %v1439_v43, %v223_v38  ;;  %1173 = vtanh.f32 %v229_v36  ;;  %v274_v33 = vshrl.u32 %v273_v32, 7 }
  0xf9   :  { %v580_v44 = vadd.f32 %v1439_v43, %v579_v40  ;;  %v1154_v45 = vpop.eup %1153  ;;  %1175 = vtanh.f32 %v585_v37  ;;  %v940_v48 = vpop.f32.mrb[12].mxu1 }
  0xfa   :  { %v1156_v46 = vpop.eup %1155  ;;  %v1063_v47 = vpack.c.bf16 %v1150_v34, %v1154_v45  ;;  %v1007_v49 = vpop.f32.mrb[12].mxu0  ;;  %1177 = vtanh.f32 %v224_v42  ;;  %v239_v52 = vadd.f32 %v940_v48, %v1439_v43  ;;  %v275_v34 = vsub.s32 0, %v274_v33 }
  0xfb   :  { %v1158_v50 = vpop.eup %1157  ;;  %v1103_v51 = vpack.c.bf16 %v1152_v41, %v1156_v46  ;;  %v595_v53 = vadd.f32 %v1007_v49, %v1439_v43  ;;  %v233_v54 = vpop.f32.mrb[13].mxu1  ;;  %1179 = vtanh.f32 %v580_v44 }
  0xfc   :  { %v589_v55 = vpop.f32.mrb[13].mxu0  ;;  %v1160_v56 = vpop.eup %1159  ;;  %1061 = vmatpush3.bf16.xpose.msk.msra.mxu1 %vm1459_vm2, %v1059_v31  ;;  %v234_v57 = vadd.f32 %v1439_v43, %v233_v54  ;;  %1181 = vtanh.f32 %v239_v52  ;;  %v34_v31 = vld [vmem:[%s1566_s4] sm:$0x1]  ;;  %s1197_s4 = scalar_lea.vmem %s750_s25, 16 }
  0xfd   :  { %v590_v58 = vadd.f32 %v1439_v43, %v589_v55  ;;  %v1162_v59 = vpop.eup %1161  ;;  %1101 = vmatpush3.bf16.xpose.msk.msra.mxu0 %vm1459_vm2, %v1099_v35  ;;  %1062 = vmatprep.subr.bf16.mxu1 %v1245_v39  ;;  %1183 = vtanh.f32 %v595_v53  ;;  %v943_v62 = vpop.f32.mrb[14].mxu1  ;;  %p1198_p0 = scmp.ne.s32.totalorder %s750_s25, %s1197_s4  ;;  %p1203_p2 = scmp.lt.s32.totalorder %s1201_s28, %s1197_s4 }
  0xfe   :  { %v1164_v60 = vpop.eup %1163  ;;  %1102 = vmatprep.subr.bf16.mxu0 %v1245_v39  ;;  %v1067_v61 = vpack.c.bf16 %v1158_v50, %v1162_v59  ;;  %v1010_v63 = vpop.f32.mrb[14].mxu0  ;;  %1185 = vtanh.f32 %v234_v57  ;;  %v249_v2 = vadd.f32 %v943_v62, %v1439_v43 }
  0xff   :  { %v1166_v0 = vpop.eup %1165  ;;  %v1107_v1 = vpack.c.bf16 %v1160_v56, %v1164_v60  ;;  %v605_v3 = vadd.f32 %v1010_v63, %v1439_v43  ;;  %v243_v4 = vpop.f32.mrb[15].mxu1  ;;  %1187 = vtanh.f32 %v590_v58  ;;  %p1204_p3 = por %p1203_p2, %p1202_p1 }
 0x100   :  { %v599_v5 = vpop.f32.mrb[15].mxu0  ;;  %v1168_v6 = vpop.eup %1167  ;;  %v244_v7 = vadd.f32 %v1439_v43, %v243_v4  ;;  %1189 = vtanh.f32 %v249_v2 }
 0x101   :  { %v600_v8 = vadd.f32 %v1439_v43, %v599_v5  ;;  %v1170_v9 = vpop.eup %1169  ;;  %1191 = vtanh.f32 %v605_v3  ;;  %v271_v35 = vpop.permute.xlu0 %270  ;;  %p1205_p4 = pnand %p1204_p3, %p1198_p0 }
 0x102   :  { %v1172_v10 = vpop.eup %1171  ;;  %v1071_v11 = vpack.c.bf16 %v1166_v0, %v1170_v9  ;;  %1193 = vtanh.f32 %v244_v7  ;;  %v276_v36 = vrot.slane %v271_v35, %v275_v34 }
 0x103   :  { %v1174_v12 = vpop.eup %1173  ;;  %v1111_v13 = vpack.c.bf16 %v1168_v6, %v1172_v10  ;;  %1195 = vtanh.f32 %v600_v8 }
 0x104   :  { %v1176_v14 = vpop.eup %1175  ;;  %1065 = vmatpush3.bf16.xpose.msk.msra.mxu1 %vm1459_vm2, %v1063_v47 }
 0x105   :  { %v1178_v16 = vpop.eup %1177  ;;  %1105 = vmatpush3.bf16.xpose.msk.msra.mxu0 %vm1459_vm2, %v1103_v51  ;;  %1066 = vmatprep.subr.bf16.mxu1 %v1245_v39 }
 0x106   :  { %v1180_v43 = vpop.eup %1179  ;;  %1106 = vmatprep.subr.bf16.mxu0 %v1245_v39  ;;  %v1075_v17 = vpack.c.bf16 %v1174_v12, %v1178_v16 }
 0x107   :  { %v1182_v18 = vpop.eup %1181  ;;  %v1115_v19 = vpack.c.bf16 %v1176_v14, %v1180_v43 }
 0x108   :  { %v1184_v20 = vpop.eup %1183 }
 0x109   :  { %v1186_v21 = vpop.eup %1185 }
 0x10a   :  { %v1188_v22 = vpop.eup %1187  ;;  %v1079_v23 = vpack.c.bf16 %v1182_v18, %v1186_v21 }
 0x10b   :  { %v1190_v24 = vpop.eup %1189  ;;  %v1119_v25 = vpack.c.bf16 %v1184_v20, %v1188_v22 }
 0x10c   :  { %v1192_v26 = vpop.eup %1191  ;;  %1069 = vmatpush3.bf16.xpose.msk.msra.mxu1 %vm1459_vm2, %v1067_v61 }
 0x10d   :  { %v1194_v27 = vpop.eup %1193  ;;  %1109 = vmatpush3.bf16.xpose.msk.msra.mxu0 %vm1459_vm2, %v1107_v1  ;;  %1070 = vmatprep.subr.bf16.mxu1 %v1245_v39 }
 0x10e   :  { %v1196_v28 = vpop.eup %1195  ;;  %1110 = vmatprep.subr.bf16.mxu0 %v1245_v39  ;;  %v1083_v29 = vpack.c.bf16 %v1190_v24, %v1194_v27 }
 0x10f   :  { %v1123_v30 = vpack.c.bf16 %v1192_v26, %v1196_v28 }
 0x114   :  { %1073 = vmatpush3.bf16.xpose.msk.msra.mxu1 %vm1459_vm2, %v1071_v11 }
 0x115   :  { %1113 = vmatpush3.bf16.xpose.msk.msra.mxu0 %vm1459_vm2, %v1111_v13  ;;  %1074 = vmatprep.subr.bf16.mxu1 %v1245_v39 }
 0x116   :  { %1114 = vmatprep.subr.bf16.mxu0 %v1245_v39 }
 0x11c   :  { %1077 = vmatpush3.bf16.xpose.msk.msra.mxu1 %vm1459_vm2, %v1075_v17 }
 0x11d   :  { %1117 = vmatpush3.bf16.xpose.msk.msra.mxu0 %vm1459_vm2, %v1115_v19  ;;  %1078 = vmatprep.subr.bf16.mxu1 %v1245_v39 }
 0x11e   :  { %1118 = vmatprep.subr.bf16.mxu0 %v1245_v39 }
 0x124   :  { %1081 = vmatpush3.bf16.xpose.msk.msra.mxu1 %vm1459_vm2, %v1079_v23 }
 0x125   :  { %1121 = vmatpush3.bf16.xpose.msk.msra.mxu0 %vm1459_vm2, %v1119_v25  ;;  %1082 = vmatprep.subr.bf16.mxu1 %v1245_v39 }
 0x126   :  { %1122 = vmatprep.subr.bf16.mxu0 %v1245_v39 }
 0x12c   :  { %1085 = vmatpush3.bf16.xpose.msk.msra.mxu1 %vm1459_vm2, %v1083_v29 }
 0x12d   :  { %1125 = vmatpush3.bf16.xpose.msk.msra.mxu0 %vm1459_vm2, %v1123_v30 }
 0x133   :  { %977 = vmatmul.mubr.msk.f32.vlgmr.msra.gmra.mrb[16].mxu1 %vm58_vm0, %v34_v31 }
 0x134   :  { %1044 = vmatmul.mubr.msk.f32.vlgmr.msra.gmra.mrb[16].mxu0 %vm58_vm0, %v34_v31 }
 0x206   :  { %v394_v39 = vpop.f32.mrb[16].mxu1 }
 0x207   :  { %v395_v15 = vadd.f32 %v394_v39, %v276_v36  ;;  %v738_v37 = vpop.f32.mrb[16].mxu0  ;;  %v978_v38 = vpop.f32.mrb[17].mxu1 }
 0x208   :  { %v739_v40 = vadd.f32 %v738_v37, %v276_v36  ;;  %v1045_v41 = vpop.f32.mrb[17].mxu0 }
 0x209   :  { %398 = vst [vmem:[#allocation3] sm:$0x1] %v395_v15 }
 0x20a   :  { %742 = vst [vmem:[#allocation5] sm:$0x1] %v739_v40 }
 0x20b   :  { %1208 = shalt.err (!%p1205_p4)
}
 0x20c   :  { %s1209_s8 = scalar_lea.hbm %s1568_s6, 16 }
 0x20d   :  { %p1210_p5 = scmp.ne.s32.totalorder %s1568_s6, %s1209_s8  ;;  %p1213_p6 = scmp.lt.u32.totalorder %s1209_s8, %s1568_s6 }
 0x20f   :  { %p1215_p7 = pnand %p1213_p6, %p1210_p5 }
 0x211   :  { %1218 = shalt.err (!%p1215_p7)
}
 0x212   :  { %752 = dma.vmem_to_hbm [thread:$0]  %s750_s25, 16, %s1568_s6, [#allocation4]  }
 0x213   :  { %s1219_s2 = scalar_lea.vmem %s1530_s27, 16  ;;  %s1223_s14 = scalar_lea.vmem %s1530_s27, 32 }
 0x214   :  { %p1220_p8 = scmp.ne.s32.totalorder %s1530_s27, %s1219_s2  ;;  %p1224_p9 = scmp.lt.s32.totalorder %s1530_s27, %s1530_s27 }
 0x215   :  { %p1225_p10 = scmp.lt.s32.totalorder %s1223_s14, %s1219_s2 }
 0x217   :  { %p1226_p11 = por %p1225_p10, %p1224_p9 }
 0x219   :  { %p1227_p12 = pnand %p1226_p11, %p1220_p8 }
 0x21b   :  { %1230 = shalt.err (!%p1227_p12)
}
 0x21c   :  { %s1231_s17 = scalar_lea.hbm %s1569_s7, 16 }
 0x21d   :  { %p1232_p13 = scmp.ne.s32.totalorder %s1569_s7, %s1231_s17  ;;  %p1235_p0 = scmp.lt.u32.totalorder %s1231_s17, %s1569_s7 }
 0x21f   :  { %p1237_p1 = pnand %p1235_p0, %p1232_p13 }
 0x221   :  { %1240 = shalt.err (!%p1237_p1)
}
 0x222   :  { %762 = dma.vmem_to_hbm [thread:$0]  %s1530_s27, 16, %s1569_s7, [#allocation6]  }
 0x223   :  { %1241 = dma.done.wait [#allocation4], 16  }
 0x224   :  { %1242 = vsyncadd [#allocation4], 4294967280 }
 0x225   :  { %1243 = dma.done.wait [#allocation6], 16  }
 0x226   :  { %1244 = vsyncadd [#allocation6], 4294967280 }
 0x227   :  { %769 = vsyncpa [#allocation4], 1 }
 0x228   :  { %770 = vsyncpa [#allocation6], 1 }

</bundles_post_ra>
